<compile_context>
chip_gen: v7x
topology: tpu7x:2x2x1
jax: 0.10.0
libtpu: 0.0.40
codegen_flags: <defaults>
</compile_context>

<pallas_src>
import functools

import jax
import jax.numpy as jnp
from jax.experimental import pallas as pl
from jax.experimental.pallas import tpu as pltpu


VMEM_SPEC = pl.BlockSpec(memory_space=pltpu.MemorySpace.VMEM)


@functools.lru_cache(maxsize=None)
def _vmem_limit():
    """Generation-aware scoped-VMEM budget (3/4 of physical, capped)."""
    try:
        cap = getattr(pltpu.get_tpu_info(), "vmem_capacity_bytes", None)
        if cap:
            # v7x: 64 MiB -> 48 MiB; v5e/v6e: 128 MiB -> 96 MiB.
            return min((int(cap) * 3) // 4, 100 * 1024 * 1024)
    except Exception:
        pass
    return 48 * 1024 * 1024


def _round_up(x, m):
    return ((x + m - 1) // m) * m


# ----------------------------- backbone linear ----------------------------- #

def _linear_bias_kernel(x_ref, w_ref, b_ref, o_ref, acc_ref):
    # Gridded o[v] = x[v] @ w + b with K-axis accumulation in f32 VMEM scratch.
    @pl.when(pl.program_id(3) == 0)
    def _():
        acc_ref[...] = jnp.zeros_like(acc_ref)

    acc_ref[...] += jnp.dot(x_ref[...].astype(jnp.bfloat16),
                            w_ref[...].astype(jnp.bfloat16),
                            preferred_element_type=jnp.float32)

    @pl.when(pl.program_id(3) == pl.num_programs(3) - 1)
    def _():
        o_ref[...] = (acc_ref[...] + b_ref[...]).astype(o_ref.dtype)


def linear_views(x, w, b, *, tm=256, tn=256, tk=512):
    """x: [V, M, K] stacked views -> [V, M, N] = x @ w + b (shared weights).

    Non-divisible dims are zero-padded (zero rows/cols are exact for a matmul)
    and sliced off afterwards, never collapsed into one oversized block.
    """
    v, m, k = x.shape
    n = w.shape[1]
    tm = min(tm, _round_up(m, 8))
    tn = min(tn, _round_up(n, 128))
    tk = min(tk, _round_up(k, 128))
    mp, np_, kp = _round_up(m, tm), _round_up(n, tn), _round_up(k, tk)
    if mp != m or kp != k:
        x = jnp.pad(x, ((0, 0), (0, mp - m), (0, kp - k)))
    if kp != k or np_ != n:
        w = jnp.pad(w, ((0, kp - k), (0, np_ - n)))
    if np_ != n:
        b = jnp.pad(b, ((0, 0), (0, np_ - n)))

    grid = (v, mp // tm, np_ // tn, kp // tk)
    out = pl.pallas_call(
        _linear_bias_kernel,
        out_shape=jax.ShapeDtypeStruct((v, mp, np_), jnp.float32),
        grid=grid,
        in_specs=[
            pl.BlockSpec((None, tm, tk), lambda vi, i, j, kk: (vi, i, kk)),
            pl.BlockSpec((tk, tn), lambda vi, i, j, kk: (kk, j)),
            pl.BlockSpec((1, tn), lambda vi, i, j, kk: (0, j)),
        ],
        out_specs=pl.BlockSpec((None, tm, tn), lambda vi, i, j, kk: (vi, i, j)),
        scratch_shapes=[pltpu.VMEM((tm, tn), jnp.float32)],
        compiler_params=pltpu.CompilerParams(
            dimension_semantics=("parallel", "parallel", "parallel", "arbitrary"),
            vmem_limit_bytes=_vmem_limit()),
    )(x, w, b)
    if mp != m or np_ != n:
        out = out[:, :m, :n]
    return out


# ------------------------------ fused projector ----------------------------- #

def _projector_kernel(h_ref, bn1g_ref, bn1b_ref, w1_ref, bn2g_ref, bn2b_ref,
                      w2_ref, lng_ref, lnb_ref, z_ref, *, eps_bn, eps_ln):
    # Fused projector for ONE view (grid axis = view), so BatchNorm training
    # statistics stay per-view exactly as in the PyTorch reference.
    h = h_ref[...]                                          # [N, hidden] f32
    inv_n = 1.0 / h.shape[0]

    # BatchNorm1d (training mode, biased batch stats) + ReLU -- single pass:
    # accumulate sum and sum-of-squares together, var = E[x^2] - mean^2.
    mu = jnp.sum(h, axis=0, keepdims=True) * inv_n
    var = jnp.maximum(jnp.sum(h * h, axis=0, keepdims=True) * inv_n - mu * mu, 0.0)
    h = (h - mu) * jax.lax.rsqrt(var + eps_bn) * bn1g_ref[...] + bn1b_ref[...]
    h = jnp.maximum(h, 0.0)

    # Linear (no bias) -- bf16 MXU operands, f32 accumulation.
    h = jnp.dot(h.astype(jnp.bfloat16), w1_ref[...].astype(jnp.bfloat16),
                preferred_element_type=jnp.float32)

    # BatchNorm1d + ReLU (single pass again).
    mu = jnp.sum(h, axis=0, keepdims=True) * inv_n
    var = jnp.maximum(jnp.sum(h * h, axis=0, keepdims=True) * inv_n - mu * mu, 0.0)
    h = (h - mu) * jax.lax.rsqrt(var + eps_bn) * bn2g_ref[...] + bn2b_ref[...]
    h = jnp.maximum(h, 0.0)

    # Linear (no bias)
    h = jnp.dot(h.astype(jnp.bfloat16), w2_ref[...].astype(jnp.bfloat16),
                preferred_element_type=jnp.float32)

    # LayerNorm over features (affine)
    mu = jnp.mean(h, axis=-1, keepdims=True)
    var = jnp.mean((h - mu) ** 2, axis=-1, keepdims=True)
    z = (h - mu) * jax.lax.rsqrt(var + eps_ln) * lng_ref[...] + lnb_ref[...]

    # L2 row-normalize epilogue (hoisted out of every contrastive_loss call);
    # equivalent to F.normalize(z, dim=1, eps=1e-12).
    z_ref[...] = z * jax.lax.rsqrt(
        jnp.maximum(jnp.sum(z * z, axis=-1, keepdims=True), 1e-24))


def projector_fused(h_views, p, eps_bn=1e-5, eps_ln=1e-5):
    """h_views: [V, N, hidden] -> [V, N, out_dim] L2-normalized projections."""
    v, n, hidden = h_views.shape
    mlp = p["w1"].shape[1]
    out_dim = p["w2"].shape[1]

    def pspec(shape):
        return pl.BlockSpec(shape, lambda vi: (0,) * len(shape))

    return pl.pallas_call(
        functools.partial(_projector_kernel, eps_bn=eps_bn, eps_ln=eps_ln),
        out_shape=jax.ShapeDtypeStruct((v, n, out_dim), jnp.float32),
        grid=(v,),
        in_specs=[
            pl.BlockSpec((None, n, hidden), lambda vi: (vi, 0, 0)),
            pspec((1, hidden)), pspec((1, hidden)),
            pspec((hidden, mlp)),
            pspec((1, mlp)), pspec((1, mlp)),
            pspec((mlp, out_dim)),
            pspec((1, out_dim)), pspec((1, out_dim)),
        ],
        out_specs=pl.BlockSpec((None, n, out_dim), lambda vi: (vi, 0, 0)),
        compiler_params=pltpu.CompilerParams(
            dimension_semantics=("parallel",),
            vmem_limit_bytes=_vmem_limit()),
    )(h_views, p["bn1_g"], p["bn1_b"], p["w1"], p["bn2_g"], p["bn2_b"],
      p["w2"], p["ln_g"], p["ln_b"])


# --------------------------- fused pair-loss kernel -------------------------- #

def _pair_loss_kernel(tbl_ref, q_ref, k_ref, loss_ref, local_ref, *, temperature):
    # Grid axis = pair index (scalar-prefetched SMEM pair table drives the
    # q/k index_maps).  Pair 0 is (z1, z2) -> `loss`; every other pair is a
    # local-crop pair and contributes 0.5 * pair to `loss_local`.
    del tbl_ref  # consumed by the index_maps only
    pair_idx = pl.program_id(0)

    @pl.when(pair_idx == 0)
    def _():
        loss_ref[...] = jnp.zeros_like(loss_ref)
        local_ref[...] = jnp.zeros_like(local_ref)

    qn = q_ref[...]                                          # [N, D], L2-normalized
    kn = k_ref[...]
    inv_t = 1.0 / temperature
    logits = jax.lax.dot_general(
        qn.astype(jnp.bfloat16), kn.astype(jnp.bfloat16),
        (((1,), (1,)), ((), ())),
        preferred_element_type=jnp.float32) * inv_t          # [N, N]
    # Positive logit = diagonal, computed as a row-wise dot (no NxN masks).
    pos = jnp.sum(qn * kn, axis=-1, keepdims=True) * inv_t   # [N, 1]

    # Rows are L2-normalized so logits <= 1/T; subtracting the constant 1/T
    # keeps exp args <= 0 for ANY positive temperature, so no per-row/column
    # max reductions are needed and only ONE NxN exp is materialized.
    p_exp = jnp.exp(logits - inv_t)                          # single N^2 exp
    lse_r = inv_t + jnp.log(jnp.sum(p_exp, axis=-1, keepdims=True))   # [N, 1]
    lse_c = inv_t + jnp.log(jnp.sum(p_exp, axis=0, keepdims=True))    # [1, N]

    mean_pos = jnp.mean(pos, keepdims=True)                  # (1, 1)
    ce_row = jnp.mean(lse_r, keepdims=True) - mean_pos       # contrastive(q, k)
    ce_col = jnp.mean(lse_c, keepdims=True) - mean_pos       # contrastive(k, q)
    pair_val = 0.5 * (ce_row + ce_col) * (2.0 * temperature)

    @pl.when(pair_idx == 0)
    def _():
        loss_ref[...] = loss_ref[...] + pair_val

    @pl.when(pair_idx != 0)
    def _():
        local_ref[...] = local_ref[...] + 0.5 * pair_val


def fused_pair_losses(z_all, pairs, temperature):
    """z_all: [V, N, D] L2-normalized; pairs: int32 [P, 2] of (q_view, k_view).

    Returns (loss, loss_local) where loss = sym pair loss of pairs[0] and
    loss_local = 0.5 * sum of sym pair losses of pairs[1:].
    """
    v, n, d = z_all.shape
    num_pairs = pairs.shape[0]

    grid_spec = pltpu.PrefetchScalarGridSpec(
        num_scalar_prefetch=1,
        grid=(num_pairs,),
        in_specs=[
            pl.BlockSpec((None, n, d), lambda pi, tbl: (tbl[pi, 0], 0, 0)),
            pl.BlockSpec((None, n, d), lambda pi, tbl: (tbl[pi, 1], 0, 0)),
        ],
        out_specs=[
            pl.BlockSpec((1, 1), lambda pi, tbl: (0, 0)),
            pl.BlockSpec((1, 1), lambda pi, tbl: (0, 0)),
        ],
    )
    loss, loss_local = pl.pallas_call(
        functools.partial(_pair_loss_kernel, temperature=temperature),
        out_shape=(jax.ShapeDtypeStruct((1, 1), jnp.float32),
                   jax.ShapeDtypeStruct((1, 1), jnp.float32)),
        grid_spec=grid_spec,
        compiler_params=pltpu.CompilerParams(
            dimension_semantics=("arbitrary",),
            vmem_limit_bytes=_vmem_limit()),
    )(pairs, z_all, z_all)
    return loss[0, 0], loss_local[0, 0]


# ------------------------------ model wrapper ------------------------------ #

def init_params(key, in_features, hidden_dim, mlp_dim, out_dim):
    ks = jax.random.split(key, 3)
    scale = 0.02
    return {
        # backbone stem (stands in for resnet50 -> hidden_dim head)
        "w_bb": scale * jax.random.normal(ks[0], (in_features, hidden_dim), jnp.float32),
        "b_bb": jnp.zeros((1, hidden_dim), jnp.float32),
        # projector: BN1d -> ReLU -> MLP(Linear/BN/ReLU/Linear, no bias) -> LN
        "bn1_g": jnp.ones((1, hidden_dim), jnp.float32),
        "bn1_b": jnp.zeros((1, hidden_dim), jnp.float32),
        "w1": scale * jax.random.normal(ks[1], (hidden_dim, mlp_dim), jnp.float32),
        "bn2_g": jnp.ones((1, mlp_dim), jnp.float32),
        "bn2_b": jnp.zeros((1, mlp_dim), jnp.float32),
        "w2": scale * jax.random.normal(ks[2], (mlp_dim, out_dim), jnp.float32),
        "ln_g": jnp.ones((1, out_dim), jnp.float32),
        "ln_b": jnp.zeros((1, out_dim), jnp.float32),
    }


def simclr_forward(samples, p, temperature=0.5):
    # All views are assumed to share one shape (true for this linear stem;
    # a real multi-crop ResNet backbone would accept mixed resolutions).
    if isinstance(samples, (list, tuple)):
        # TODO(synk): stacking copies each view once; pass a pre-stacked
        # [V, N, ...] array (as in __main__) to avoid this HBM round-trip.
        x = jnp.stack(list(samples), axis=0)
    else:
        x = samples                                           # [V, N, ...]
    v, n = x.shape[0], x.shape[1]
    x = x.reshape(v, n, -1).astype(jnp.float32)               # free reshape

    # Backbone: one gridded matmul over the stacked views (no batch stats ->
    # exactly equivalent to per-view forward passes).
    h_all = linear_views(x, p["w_bb"], p["b_bb"])             # [V, N, hidden]

    # Fused projector, grid over views (per-view BN stats), L2-normalized out.
    z_all = projector_fused(h_all, p)                         # [V, N, out]

    # Pair table: (z1, z2) -> loss; (z1, lp) and (z2, lp) per crop -> loss_local.
    pair_list = [(0, 1)]
    for i in range(2, v):
        pair_list.append((0, i))
        pair_list.append((1, i))
    pairs = jnp.asarray(pair_list, dtype=jnp.int32)

    # (v1 = z1.square().sum(1) in the reference is dead code; omitted)
    loss, loss_local = fused_pair_losses(z_all, pairs, temperature)

    log = {"loss": loss, "loss_local": loss_local}
    return loss + loss_local, log


# ----------------------------------- main ----------------------------------- #

if __name__ == "__main__":
    N, C, H, W = 8, 4, 16, 16
    hidden_dim, mlp_dim, out_dim = 128, 128, 128
    temperature = 0.5

    key = jax.random.PRNGKey(0)
    k_x, k_p = jax.random.split(key, 2)
    # Pre-stacked [V, N, C, H, W]: 2 global views + 1 local crop (no wrapper
    # concatenate needed).
    x_views = jax.random.normal(k_x, (3, N, C, H, W), jnp.float32)
    params = init_params(k_p, C * H * W, hidden_dim, mlp_dim, out_dim)

    total_loss, log = simclr_forward(x_views, params, temperature)
    jax.block_until_ready(total_loss)
    jax.block_until_ready(log["loss"])
    jax.block_until_ready(log["loss_local"])
    print("KERNEL_OK")
</pallas_src>

<mosaic_0001>
module attributes {stable_mosaic.version = 11 : i64} {
  func.func @_linear_bias_kernel(%arg0: i32, %arg1: i32, %arg2: i32, %arg3: i32, %arg4: memref<1x8x512xf32, #tpu.memory_space<vmem>>, %arg5: memref<512x128xf32, #tpu.memory_space<vmem>>, %arg6: memref<1x128xf32, #tpu.memory_space<vmem>>, %arg7: memref<1x8x128xf32, #tpu.memory_space<vmem>>, %arg8: memref<8x128xf32, #tpu.memory_space<vmem>>) attributes {dimension_semantics = [#tpu.dimension_semantics<parallel>, #tpu.dimension_semantics<parallel>, #tpu.dimension_semantics<parallel>, #tpu.dimension_semantics<arbitrary>], iteration_bounds = array<i64: 3, 1, 1, 2>, scalar_prefetch = 0 : i64, scratch_operands = 1 : i64, tpu.core_type = #tpu.core_type<tc>, window_params = [{transform_indices = @transform_0, window_bounds = array<i64: 1, 8, 512>}, {transform_indices = @transform_1, window_bounds = array<i64: 512, 128>}, {transform_indices = @transform_2, window_bounds = array<i64: 1, 128>}, {transform_indices = @transform_3, window_bounds = array<i64: 1, 8, 128>}]} {
    %c0_i32 = arith.constant 0 : i32
    %0 = arith.cmpi eq, %arg3, %c0_i32 : i32
    %1 = arith.extui %0 : i1 to i32
    %c0_i32_0 = arith.constant 0 : i32
    %2 = arith.cmpi ne, %1, %c0_i32_0 : i32
    scf.if %2 {
      %cst_10 = arith.constant 0.000000e+00 : f32
      %15 = vector.broadcast %cst_10 : f32 to vector<8x128xf32>
      %c0_11 = arith.constant 0 : index
      %c0_12 = arith.constant 0 : index
      %16 = vector.load %arg8[%c0_11, %c0_12] : memref<8x128xf32, #tpu.memory_space<vmem>>, vector<8x128xf32>
      tpu.vector_store %arg8[%c0_11, %c0_12], %15 {strides = array<i32>} : memref<8x128xf32, #tpu.memory_space<vmem>>, vector<8x128xf32>,
    } else {
    }
    %c0 = arith.constant 0 : index
    %c0_1 = arith.constant 0 : index
    %3 = vector.load %arg8[%c0, %c0_1] : memref<8x128xf32, #tpu.memory_space<vmem>>, vector<8x128xf32>
    %c0_2 = arith.constant 0 : index
    %c0_3 = arith.constant 0 : index
    %c0_4 = arith.constant 0 : index
    %4 = vector.load %arg4[%c0_2, %c0_3, %c0_4] : memref<1x8x512xf32, #tpu.memory_space<vmem>>, vector<1x8x512xf32>
    %5 = vector.shape_cast %4 : vector<1x8x512xf32> to vector<8x512xf32>
    %6 = arith.truncf %5 : vector<8x512xf32> to vector<8x512xbf16>
    %c0_5 = arith.constant 0 : index
    %c0_6 = arith.constant 0 : index
    %7 = vector.load %arg5[%c0_5, %c0_6] : memref<512x128xf32, #tpu.memory_space<vmem>>, vector<512x128xf32>
    %8 = arith.truncf %7 : vector<512x128xf32> to vector<512x128xbf16>
    %cst = arith.constant dense<0.000000e+00> : vector<8x128xf32>
    %9 = tpu.matmul %6, %8, %cst {dimension_numbers = #tpu.dot_dimension_numbers<[1], [0], [0], [1], [0, 0, 1, 1], [], []>} : vector<8x512xbf16>, vector<512x128xbf16>, vector<8x128xf32> -> vector<8x128xf32>
    %10 = arith.addf %3, %9 : vector<8x128xf32>
    %c0_7 = arith.constant 0 : index
    %c0_8 = arith.constant 0 : index
    %11 = vector.load %arg8[%c0_7, %c0_8] : memref<8x128xf32, #tpu.memory_space<vmem>>, vector<8x128xf32>
    tpu.vector_store %arg8[%c0_7, %c0_8], %10 {strides = array<i32>} : memref<8x128xf32, #tpu.memory_space<vmem>>, vector<8x128xf32>,
    %c1_i32 = arith.constant 1 : i32
    %12 = arith.cmpi eq, %arg3, %c1_i32 : i32
    %13 = arith.extui %12 : i1 to i32
    %c0_i32_9 = arith.constant 0 : i32
    %14 = arith.cmpi ne, %13, %c0_i32_9 : i32
    scf.if %14 {
      %c0_10 = arith.constant 0 : index
      %c0_11 = arith.constant 0 : index
      %15 = vector.load %arg8[%c0_10, %c0_11] : memref<8x128xf32, #tpu.memory_space<vmem>>, vector<8x128xf32>
      %c0_12 = arith.constant 0 : index
      %c0_13 = arith.constant 0 : index
      %16 = vector.load %arg6[%c0_12, %c0_13] : memref<1x128xf32, #tpu.memory_space<vmem>>, vector<1x128xf32>
      %17 = vector.broadcast %16 : vector<1x128xf32> to vector<8x128xf32>
      %18 = arith.addf %15, %17 : vector<8x128xf32>
      %c0_14 = arith.constant 0 : index
      %c0_15 = arith.constant 0 : index
      %c0_16 = arith.constant 0 : index
      %19 = vector.load %arg7[%c0_14, %c0_15, %c0_16] : memref<1x8x128xf32, #tpu.memory_space<vmem>>, vector<1x8x128xf32>
      %20 = vector.shape_cast %19 : vector<1x8x128xf32> to vector<8x128xf32>
      %21 = vector.shape_cast %18 : vector<8x128xf32> to vector<1x8x128xf32>
      tpu.vector_store %arg7[%c0_14, %c0_15, %c0_16], %21 {strides = array<i32>} : memref<1x8x128xf32, #tpu.memory_space<vmem>>, vector<1x8x128xf32>,
    } else {
    }
    return
  }
  func.func @transform_0(%arg0: i32, %arg1: i32, %arg2: i32, %arg3: i32) -> (i32, i32, i32) {
    %c0_i32 = arith.constant 0 : i32
    return %arg0, %arg1, %arg3 : i32, i32, i32
  }
  func.func @transform_1(%arg0: i32, %arg1: i32, %arg2: i32, %arg3: i32) -> (i32, i32) {
    %c0_i32 = arith.constant 0 : i32
    return %arg3, %arg2 : i32, i32
  }
  func.func @transform_2(%arg0: i32, %arg1: i32, %arg2: i32, %arg3: i32) -> (i32, i32) {
    %c0_i32 = arith.constant 0 : i32
    %c0_i32_0 = arith.constant 0 : i32
    return %c0_i32, %arg2 : i32, i32
  }
  func.func @transform_3(%arg0: i32, %arg1: i32, %arg2: i32, %arg3: i32) -> (i32, i32, i32) {
    %c0_i32 = arith.constant 0 : i32
    return %arg0, %arg1, %arg2 : i32, i32, i32
  }
}

</mosaic_0001>

<bundles_post_ra>
// kernel: tpu_custom_call.1
= control target key start
LH: loop header
LB: loop body
LE: loop exit
PB: predicated region body
PF: predicated region fallthrough
CT: control target
= control target key end

     0   :  { %8 = vsyncpa [#allocation4], 0  ;;  %s1498_s0 = inlined_call_operand.hbm [shape: f32[3,8,1024], index: 0, kind: input, shape index: {}]   ;;  %s1499_s1 = inlined_call_operand.hbm [shape: f32[1024,128], index: 1, kind: input, shape index: {}]   ;;  %s1500_s2 = inlined_call_operand.vmem [shape: f32[1,128], index: 2, kind: input, shape index: {}]   ;;  %s1501_s3 = inlined_call_operand.hbm [shape: f32[3,8,128], index: 3, kind: output, shape index: {}]  }
   0x1   :  { %10 = vsyncpa [#allocation4 + $0x1], 0 }
   0x2   :  { %11 = vsyncpa [#allocation7], 0 }
   0x3   :  { %13 = vsyncpa [#allocation7 + $0x1], 0 }
   0x4   :  { %14 = vsyncpa [#allocation5], 0 }
   0x5   :  { %16 = vsyncpa [#allocation5 + $0x1], 0  ;;  %s1078_s12 = smov 0   ;;  %s1080_s13 = smov 0  }
   0x6   :  { %s1082_s14 = smov 0   ;;  %s1084_s15 = smov 0  }
   0x7   :  { %s1086_s16 = smov 0   ;;  %s1088_s17 = smov 0  }
   0x8   :  { %s1090_s18 = smov 0   ;;  %s1092_s19 = smov 0  }
   0x9   :  { %s1094_s20 = smov 0   ;;  %s1096_s21 = smov 0  }
   0xa   :  { %s1098_s22 = smov 0   ;;  %s1100_s23 = smov 0  }
   0xb   :  { %s1102_s24 = smov 0   ;;  %s1104_s25 = smov 0  }
   0xc LB: > { %1511 = sst [smem:[#allocation12_spill]] %s998_s12  ;;  %s1502_s26 = sadd.s32 4294967295, %s1050_s25   ;;  %s1050_s25 = sphi %s1104_s25, %s22_s25   ;;  %s1046_s24 = sphi %s1102_s24, %s1555_s24   ;;  %s1042_s23 = sphi %s1100_s23, %s1554_s23   ;;  %s1038_s22 = sphi %s1098_s22, %s1553_s22   ;;  %s1034_s21 = sphi %s1096_s21, %s1552_s21   ;;  %s1030_s20 = sphi %s1094_s20, %s1542_s20   ;;  %s1026_s19 = sphi %s1092_s19, %s1551_s19   ;;  %s1022_s18 = sphi %s1090_s18, %s1550_s18   ;;  %s1018_s17 = sphi %s1088_s17, %s1549_s17   ;;  %s1014_s16 = sphi %s1086_s16, %s1548_s16   ;;  %s1010_s15 = sphi %s1084_s15, %s1547_s15   ;;  %s1006_s14 = sphi %s1082_s14, %s1539_s14   ;;  %s1002_s13 = sphi %s1080_s13, %s1546_s13   ;;  %s998_s12 = sphi %s1078_s12, %s1545_s12  }
   0xd   : > { %1512 = sst [smem:[#allocation13_spill]] %s1006_s14  ;;  %s37_s28 = sadd.s32 1, %s1042_s23 }
   0xe   : > { %1513 = sst [smem:[#allocation14_spill]] %s1030_s20  ;;  %s48_s29 = sadd.s32 1, %s1046_s24 }
   0xf   : > { %p38_p0 = scmp.ge.s32.totalorder %s37_s28, 2  ;;  %s59_s30 = sadd.s32 1, %s1030_s20 }
  0x10   : > { %p66_p1 = scmp.ne.s32.totalorder %s1030_s20, %s1026_s19  ;;  %p67_p2 = scmp.eq.s32.totalorder %s1050_s25, 0 }
  0x11   : > { %s1557_s28 = smov (%p38_p0, %s37_s28), 0  ;;  %s1559_s29 = smov (!%p38_p0, %s48_s29), %s1046_s24 }
  0x12   : > { %1514 = sst [smem:[#allocation15_spill]] %s1557_s28  ;;  %s55_s4 = ssub.s32 %s1042_s23, %s1557_s28 }
  0x13   : > { %p1161_p3 = por %p67_p2, %p66_p1  ;;  %p50_p4 = scmp.ge.s32.totalorder %s1559_s29, 3 }
  0x14   : > { %p72_p5 = scmp.ne.s32.totalorder %s1026_s19, %s1022_s18  ;;  %p1168_p6 = scmp.eq.s32.totalorder %s1502_s26, 0 }
  0x15   : > { %p85_p7 = scmp.eq.s32.totalorder %s55_s4, 0  ;;  %s1561_s29 = smov (%p50_p4, %s1559_s29), 0 }
  0x16   : > { %1517 = sst [smem:[#allocation16_spill]] %s1561_s29  ;;  %p1176_p8 = por %p1168_p6, %p72_p5 }
  0x17   : > { %s87_s8 = sadd.s32 1, %s1018_s17  ;;  %s52_s9 = ssub.s32 %s1046_s24, %s1561_s29 }
  0x18   : > { %s1518_s7 = scalar_select %p1176_p8, 1, 0 }
  0x19   : > { %p94_p9 = scmp.ne.s32.totalorder %s1018_s17, %s1014_s16  ;;  %s56_s10 = sor.u32 %s55_s4, %s52_s9 }
  0x1a   : > { %p100_p10 = scmp.ne.s32.totalorder %s1014_s16, %s1010_s15  ;;  %p57_p11 = scmp.eq.s32.totalorder %s56_s10, 0 }
  0x1b   : > { %p1189_p12 = por %p94_p9, %p67_p2  ;;  %p141_p0 = scmp.eq.s32.totalorder %s52_s9, 0 }
  0x1c   : > { %s1194_s18 = scalar_select %p85_p7, %s1018_s17, %s87_s8  }
  0x1d   : > { %s1197_s27 = scalar_select %p57_p11, %s1030_s20, %s59_s30  }
  0x1e   : > { %1520 = sst [smem:[#allocation17_spill]] %s1194_s18  ;;  %p1201_p13 = por %p100_p10, %p1168_p6 }
  0x1f   : > { %1521 = sst [smem:[#allocation18_spill]] %s1197_s27  ;;  %s143_s15 = sadd.s32 1, %s1006_s14 }
  0x20   : > { %s1522_s26 = scalar_select %p1201_p13, 1, 0 }
  0x21   : > { %p153_p1 = scmp.ne.s32.totalorder %s1006_s14, %s1002_s13  ;;  %s1524_s10 = sadd.s32 4294967295, %s1050_s25  }
  0x22   : > { %s1209_s4 = scalar_select %p141_p0, %s1006_s14, %s143_s15  }
  0x23   : > { %p154_p2 = scmp.eq.s32.totalorder %s1524_s10, 5  ;;  %p159_p4 = scmp.ne.s32.totalorder %s1002_s13, %s998_s12 }
  0x24   : > { %1523 = sst [smem:[#allocation19_spill]] %s1209_s4  ;;  %s1525_s8 = sadd.s32 4294967294, %s1050_s25  }
  0x25   : > { %p160_p5 = scmp.eq.s32.totalorder %s1525_s8, 5  ;;  %p1217_p7 = por %p154_p2, %p153_p1 }
  0x26   : > { %p723_p6 = scmp.lt.s32.totalorder %s1050_s25, 6  ;;  %s186_s9 = sand.u32 1, %s1030_s20  }
  0x27   : > { %s1526_s30 = scalar_select %p1217_p7, 1, 0 }
  0x28   : > { %p1222_p9 = por %p160_p5, %p159_p4  ;;  %s643_s15 = sshll.u32 %s186_s9, 5 }
  0x29   : > { %s644_s29 = sshll.u32 %s1042_s23, 2  ;;  %s645_s28 = sshll.u32 %s1046_s24, 3 }
  0x2a   : > { %s1527_s6 = scalar_select %p1222_p9, 1, 0 }
  0x2b   : > { %s190_s10 = scalar_lea.vmem [#allocation3], %s643_s15  ;;  %s198_s18 = sadd.s32 %s645_s28, %s644_s29 }
  0x2c   : > { %s202_s27 = sshll.u32 %s190_s10, 4  ;;  %s646_s8 = sshll.u32 %s198_s18, 7  ;;  %s1229_s27 = int_to_ptr.vmem [resolvable:$true] %s202_s27 }
  0x2d   : > { %p1235_p10 = pnand %p723_p6, %p1161_p3  ;;  %s1242_s20 = scalar_lea.hbm %s1498_s0, %s646_s8 }
  0x2e   : > { %p1248_p11 = pnand %p723_p6, %p1189_p12  ;;  %s187_s29 = scalar_lea.sflag [#allocation4], %s186_s9 }
  0x2f   : > { %s840_s5 = scalar_lea.hbm %s1242_s20, 512  ;;  %p842_p1 = pneg %p1235_p10 }
  0x30   : > { %p841_p0 = scmp.ne.s32.totalorder %s1242_s20, %s840_s5  ;;  %s845_s11 = scalar_lea.hbm %s1498_s0, 3072 }
  0x31   : > { %p846_p12 = scmp.lt.u32.totalorder %s1242_s20, %s1498_s0  ;;  %p847_p5 = scmp.lt.u32.totalorder %s845_s11, %s840_s5 }
  0x32   : > { %p843_p2 = pnand %p842_p1, %p841_p0  ;;  %p849_p3 = scmp.lt.u32.totalorder %s840_s5, %s1242_s20 }
  0x33   : > { %p848_p6 = por %p847_p5, %p846_p12 }
  0x34   : > { %p844_p4 = pneg %p843_p2 }
  0x35   : > { %p850_p9 = por %p849_p3, %p848_p6 }
  0x37   : > { %p851_p7 = pnand %p850_p9, %p844_p4 }
  0x39   : > { %854 = shalt.err (!%p851_p7)
}
  0x3a   : > { %s855_s9 = scalar_lea.vmem %s1229_s27, 512  ;;  %s1052_s10 = smov [#allocation3]  }
  0x3b   : > { %p856_p0 = scmp.ne.s32.totalorder %s1229_s27, %s855_s9  ;;  %s860_s8 = sshll.u32 %s1052_s10, 4  ;;  %s861_s8 = int_to_ptr.vmem [resolvable:$false] %s860_s8 }
  0x3c   : > { %s862_s12 = scalar_lea.vmem %s861_s8, 1024  ;;  %p863_p8 = scmp.lt.s32.totalorder %s1229_s27, %s861_s8 }
  0x3d   : > { %p858_p2 = pnand %p856_p0, %p842_p1  ;;  %p864_p12 = scmp.lt.s32.totalorder %s862_s12, %s855_s9 }
  0x3f   : > { %p859_p13 = pneg %p858_p2  ;;  %p865_p5 = por %p864_p12, %p863_p8 }
  0x41   : > { %p866_p3 = pnand %p865_p5, %p859_p13 }
  0x43   : > { %869 = shalt.err (!%p866_p3)
}
  0x44   : > { %715 = dma.hbm_to_vmem [thread:$0]  (!%p1235_p10), %s1242_s20, 512, %s1229_s27, %s187_s29  }
  0x45   : > { %p229_p7 = scmp.lt.s32.totalorder %s1050_s25, 7  ;;  %s209_s5 = sand.u32 1, %s1018_s17  }
  0x46   : > { %s661_s14 = sshll.u32 %s1042_s23, 13  ;;  %p1530_p9 = scmp.ge.s32.totalorder %s1050_s25, 1 }
  0x47   : > { %s647_s18 = sshll.u32 %s209_s5, 9  ;;  %s1290_s9 = scalar_lea.hbm %s1499_s1, %s661_s14 }
  0x48   : > { %p1283_p1 = pnand %p1530_p9, %p229_p7  ;;  %s213_s10 = scalar_lea.vmem [#allocation6], %s647_s18 }
  0x49   : > { %s221_s20 = sshll.u32 %s213_s10, 4  ;;  %s1294_s27 = scalar_lea.sflag [#allocation7], %s209_s5  ;;  %s1292_s20 = int_to_ptr.vmem [resolvable:$true] %s221_s20 }
  0x4a   : > { %s870_s29 = scalar_lea.hbm %s1290_s9, 8192  ;;  %p872_p13 = pneg %p1248_p11 }
  0x4b   : > { %p871_p8 = scmp.ne.s32.totalorder %s1290_s9, %s870_s29  ;;  %s875_s14 = scalar_lea.hbm %s1499_s1, 16384 }
  0x4c   : > { %p876_p6 = scmp.lt.u32.totalorder %s1290_s9, %s1499_s1  ;;  %p877_p0 = scmp.lt.u32.totalorder %s875_s14, %s870_s29 }
  0x4d   : > { %p873_p10 = pnand %p872_p13, %p871_p8  ;;  %p879_p12 = scmp.lt.u32.totalorder %s870_s29, %s1290_s9 }
  0x4e   : > { %p878_p2 = por %p877_p0, %p876_p6 }
  0x4f   : > { %p874_p4 = pneg %p873_p10 }
  0x50   : > { %p880_p5 = por %p879_p12, %p878_p2 }
  0x52   : > { %p881_p3 = pnand %p880_p5, %p874_p4 }
  0x54   : > { %884 = shalt.err (!%p881_p3)
}
  0x55   : > { %s885_s5 = scalar_lea.vmem %s1292_s20, 8192  ;;  %s1053_s18 = smov [#allocation6]  }
  0x56   : > { %p886_p7 = scmp.ne.s32.totalorder %s1292_s20, %s885_s5  ;;  %s890_s10 = sshll.u32 %s1053_s18, 4  ;;  %s891_s10 = int_to_ptr.vmem [resolvable:$false] %s890_s10 }
  0x57   : > { %s892_s8 = scalar_lea.vmem %s891_s10, 16384  ;;  %p893_p10 = scmp.lt.s32.totalorder %s1292_s20, %s891_s10 }
  0x58   : > { %p888_p9 = pnand %p886_p7, %p872_p13  ;;  %p894_p6 = scmp.lt.s32.totalorder %s892_s8, %s885_s5 }
  0x5a   : > { %p889_p8 = pneg %p888_p9  ;;  %p895_p0 = por %p894_p6, %p893_p10 }
  0x5c   : > { %p896_p2 = pnand %p895_p0, %p889_p8 }
  0x5e   : > { %899 = shalt.err (!%p896_p2)
}
  0x5f   : > { %s1054_s29 = smov 128   ;;  %s1055_s12 = smov 8  }
  0x60   : > { %718 = dma.hbm_to_vmem [thread:$0]  (!%p1248_p11), %s1290_s9, 8192, %s1292_s20, %s1294_s27, %s1054_s29, %s1054_s29, %s1055_s12  }
  0x61   : > { %233 = sbr.rel (%p1283_p1) target bundleno = 410 (0x19a), region = 32  ;;  %s235_s14 = sand.u32 (!%p1283_p1), 1, %s1026_s19  }
  0x62   : > { %s651_s15 = sshll.u32 (!%p1283_p1), %s235_s14, 5  ;;  %s236_s4 = scalar_lea.sflag (!%p1283_p1), [#allocation4], %s235_s14 }
  0x63   : > { %s1325_s5 = scalar_lea.vmem (!%p1283_p1), [#allocation3], %s651_s15  ;;  %p1532_p13 = scmp.ne.s32.totalorder (!%p1283_p1), %s1518_s7, 0 }
  0x68   : > { %985 = dma.done.wait (%p1532_p13), %s236_s4, 512  }
  0x69   : > { %987 = vsyncadd (%p1532_p13), %s236_s4, 4294966784  ;;  %s244_s18 = sand.u32 1, %s1014_s16   ;;  %p1533_p11 = scmp.ne.s32.totalorder %s1522_s26, 0 }
  0x6a   : > { %s652_s28 = sshll.u32 %s244_s18, 9  ;;  %s245_s9 = scalar_lea.sflag [#allocation7], %s244_s18 }
  0x6b   : > { %s1332_s20 = scalar_lea.vmem [#allocation6], %s652_s28 }
  0x6c   : > { %989 = dma.done.wait (%p1533_p11), %s245_s9, 8192  }
  0x6d   : > { %991 = vsyncadd (%p1533_p11), %s245_s9, 4294959104  ;;  %s276_s11 = sand.u32 1, %s1002_s13   ;;  %p654_p1 = scmp.ne.s32.totalorder %s1034_s21, 0 }
  0x6e   : > { %s1341_s27 = sshll.u32 %s276_s11, 3  ;;  %v1056_v0 = vmov (!%p654_p1), 0.0  }
  0x6f   : > { %s278_s7 = scalar_lea.vmem [#allocation8], %s1341_s27  ;;  %288 = sbr.rel (%p654_p1) target bundleno = 118 (0x76), region = 44  ;;  %289 = vst [vmem:[#allocation2] sm:$0xff] (!%p654_p1), %v1056_v0 }
  0x76 PF: > { %v315_v1 = vld [vmem:[%s1332_s20 + $0x80] sm:$0xff]  ;;  %v316_v2 = vld [vmem:[%s1332_s20 + $0x88] sm:$0xff]  ;;  %v317_v12 = vld [vmem:[%s1332_s20 + $0x90] sm:$0xff]  ;;  %p655_p4 = scmp.ne.s32.totalorder %s1034_s21, 1 }
  0x77   : > { %v347_v3 = vld [vmem:[%s1332_s20 + $0x180] sm:$0xff]  ;;  %v371_v4 = vpack.c.bf16 %v316_v2, %v315_v1  ;;  %v348_v5 = vld [vmem:[%s1332_s20 + $0x188] sm:$0xff]  ;;  %v318_v14 = vld [vmem:[%s1332_s20 + $0x98] sm:$0xff] }
  0x78   : > { %v299_v6 = vld [vmem:[%s1332_s20] sm:$0xff]  ;;  %v300_v7 = vld [vmem:[%s1332_s20 + $0x8] sm:$0xff]  ;;  %v387_v8 = vpack.c.bf16 %v348_v5, %v347_v3  ;;  %v349_v15 = vld [vmem:[%s1332_s20 + $0x190] sm:$0xff]  ;;  %v372_v17 = vpack.c.bf16 %v318_v14, %v317_v12 }
  0x79   : > { %v363_v9 = vpack.c.bf16 %v300_v7, %v299_v6  ;;  %v331_v10 = vld [vmem:[%s1332_s20 + $0x100] sm:$0xff]  ;;  %v332_v11 = vld [vmem:[%s1332_s20 + $0x108] sm:$0xff]  ;;  %662 = vmatprep.subr.bf16.mxu0 %v371_v4  ;;  %v350_v16 = vld [vmem:[%s1332_s20 + $0x198] sm:$0xff] }
  0x7a   : > { %v379_v13 = vpack.c.bf16 %v332_v11, %v331_v10  ;;  %684 = vmatprep.subr.bf16.mxu1 %v387_v8  ;;  %v388_v18 = vpack.c.bf16 %v350_v16, %v349_v15  ;;  %v301_v19 = vld [vmem:[%s1332_s20 + $0x10] sm:$0xff]  ;;  %v302_v20 = vld [vmem:[%s1332_s20 + $0x18] sm:$0xff]  ;;  %v319_v24 = vld [vmem:[%s1332_s20 + $0xa0] sm:$0xff] }
  0x7b   : > { %663 = vmatpush3.bf16.msra.mxu0 %v363_v9  ;;  %v333_v21 = vld [vmem:[%s1332_s20 + $0x110] sm:$0xff]  ;;  %v364_v22 = vpack.c.bf16 %v302_v20, %v301_v19  ;;  %v334_v23 = vld [vmem:[%s1332_s20 + $0x118] sm:$0xff]  ;;  %v320_v25 = vld [vmem:[%s1332_s20 + $0xa8] sm:$0xff] }
  0x7c   : > { %685 = vmatpush3.bf16.msra.mxu1 %v379_v13  ;;  %664 = vmatprep.subr.bf16.mxu0 %v372_v17  ;;  %v380_v26 = vpack.c.bf16 %v334_v23, %v333_v21  ;;  %v373_v27 = vpack.c.bf16 %v320_v25, %v319_v24  ;;  %v351_v28 = vld [vmem:[%s1332_s20 + $0x1a0] sm:$0xff]  ;;  %v352_v29 = vld [vmem:[%s1332_s20 + $0x1a8] sm:$0xff]  ;;  %v321_v36 = vld [vmem:[%s1332_s20 + $0xb0] sm:$0xff] }
  0x7d   : > { %686 = vmatprep.subr.bf16.mxu1 %v388_v18  ;;  %v303_v30 = vld [vmem:[%s1332_s20 + $0x20] sm:$0xff]  ;;  %v389_v31 = vpack.c.bf16 %v352_v29, %v351_v28  ;;  %v304_v32 = vld [vmem:[%s1332_s20 + $0x28] sm:$0xff]  ;;  %v322_v37 = vld [vmem:[%s1332_s20 + $0xb8] sm:$0xff] }
  0x7e   : > { %v335_v33 = vld [vmem:[%s1332_s20 + $0x120] sm:$0xff]  ;;  %v336_v34 = vld [vmem:[%s1332_s20 + $0x128] sm:$0xff]  ;;  %v365_v35 = vpack.c.bf16 %v304_v32, %v303_v30  ;;  %v353_v38 = vld [vmem:[%s1332_s20 + $0x1b0] sm:$0xff]  ;;  %v374_v40 = vpack.c.bf16 %v322_v37, %v321_v36 }
  0x7f   : > { %665 = vmatpush3.bf16.msra.mxu0 %v364_v22  ;;  %v381_v39 = vpack.c.bf16 %v336_v34, %v335_v33  ;;  %v354_v41 = vld [vmem:[%s1332_s20 + $0x1b8] sm:$0xff]  ;;  %v305_v42 = vld [vmem:[%s1332_s20 + $0x30] sm:$0xff]  ;;  %v323_v47 = vld [vmem:[%s1332_s20 + $0xc0] sm:$0xff] }
  0x80   : > { %687 = vmatpush3.bf16.msra.mxu1 %v380_v26  ;;  %666 = vmatprep.subr.bf16.mxu0 %v373_v27  ;;  %v306_v43 = vld [vmem:[%s1332_s20 + $0x38] sm:$0xff]  ;;  %v390_v44 = vpack.c.bf16 %v354_v41, %v353_v38  ;;  %v337_v45 = vld [vmem:[%s1332_s20 + $0x130] sm:$0xff]  ;;  %v324_v48 = vld [vmem:[%s1332_s20 + $0xc8] sm:$0xff] }
  0x81   : > { %688 = vmatprep.subr.bf16.mxu1 %v389_v31  ;;  %v338_v46 = vld [vmem:[%s1332_s20 + $0x138] sm:$0xff]  ;;  %v355_v49 = vld [vmem:[%s1332_s20 + $0x1c0] sm:$0xff]  ;;  %v356_v50 = vld [vmem:[%s1332_s20 + $0x1c8] sm:$0xff]  ;;  %v366_v51 = vpack.c.bf16 %v306_v43, %v305_v42  ;;  %v375_v53 = vpack.c.bf16 %v324_v48, %v323_v47 }
  0x82   : > { %v382_v52 = vpack.c.bf16 %v338_v46, %v337_v45  ;;  %v307_v54 = vld [vmem:[%s1332_s20 + $0x40] sm:$0xff]  ;;  %v308_v55 = vld [vmem:[%s1332_s20 + $0x48] sm:$0xff]  ;;  %v391_v57 = vpack.c.bf16 %v356_v50, %v355_v49  ;;  %v325_v59 = vld [vmem:[%s1332_s20 + $0xd0] sm:$0xff] }
  0x83   : > { %667 = vmatpush3.bf16.msra.mxu0 %v365_v35  ;;  %v339_v56 = vld [vmem:[%s1332_s20 + $0x140] sm:$0xff]  ;;  %v340_v58 = vld [vmem:[%s1332_s20 + $0x148] sm:$0xff]  ;;  %v326_v60 = vld [vmem:[%s1332_s20 + $0xd8] sm:$0xff]  ;;  %v367_v63 = vpack.c.bf16 %v308_v55, %v307_v54 }
  0x84   : > { %689 = vmatpush3.bf16.msra.mxu1 %v381_v39  ;;  %668 = vmatprep.subr.bf16.mxu0 %v374_v40  ;;  %v357_v61 = vld [vmem:[%s1332_s20 + $0x1d0] sm:$0xff]  ;;  %v358_v62 = vld [vmem:[%s1332_s20 + $0x1d8] sm:$0xff]  ;;  %v383_v0 = vpack.c.bf16 %v340_v58, %v339_v56  ;;  %v376_v1 = vpack.c.bf16 %v326_v60, %v325_v59  ;;  %v327_v7 = vld [vmem:[%s1332_s20 + $0xe0] sm:$0xff] }
  0x85   : > { %690 = vmatprep.subr.bf16.mxu1 %v390_v44  ;;  %v309_v2 = vld [vmem:[%s1332_s20 + $0x50] sm:$0xff]  ;;  %v310_v3 = vld [vmem:[%s1332_s20 + $0x58] sm:$0xff]  ;;  %v392_v5 = vpack.c.bf16 %v358_v62, %v357_v61  ;;  %v328_v8 = vld [vmem:[%s1332_s20 + $0xe8] sm:$0xff] }
  0x86   : > { %v341_v4 = vld [vmem:[%s1332_s20 + $0x150] sm:$0xff]  ;;  %v342_v6 = vld [vmem:[%s1332_s20 + $0x158] sm:$0xff]  ;;  %v359_v9 = vld [vmem:[%s1332_s20 + $0x1e0] sm:$0xff]  ;;  %v368_v11 = vpack.c.bf16 %v310_v3, %v309_v2  ;;  %v377_v15 = vpack.c.bf16 %v328_v8, %v327_v7 }
  0x87   : > { %669 = vmatpush3.bf16.msra.mxu0 %v366_v51  ;;  %v360_v10 = vld [vmem:[%s1332_s20 + $0x1e8] sm:$0xff]  ;;  %v311_v12 = vld [vmem:[%s1332_s20 + $0x60] sm:$0xff]  ;;  %v384_v14 = vpack.c.bf16 %v342_v6, %v341_v4  ;;  %v294_v18 = vld [vmem:[%s1325_s5 + $0x18] sm:$0xff] }
  0x88   : > { %691 = vmatpush3.bf16.msra.mxu1 %v382_v52  ;;  %670 = vmatprep.subr.bf16.mxu0 %v375_v53  ;;  %v312_v13 = vld [vmem:[%s1332_s20 + $0x68] sm:$0xff]  ;;  %v343_v16 = vld [vmem:[%s1332_s20 + $0x160] sm:$0xff]  ;;  %v393_v19 = vpack.c.bf16 %v360_v10, %v359_v9  ;;  %v329_v21 = vld [vmem:[%s1332_s20 + $0xf0] sm:$0xff]  ;;  %v298_v24 = vpack.c.bf16 %v294_v18, %v294_v18 }
  0x89   : > { %692 = vmatprep.subr.bf16.mxu1 %v391_v57  ;;  %v292_v17 = vld [vmem:[%s1325_s5 + $0x8] sm:$0xff]  ;;  %v330_v22 = vld [vmem:[%s1332_s20 + $0xf8] sm:$0xff]  ;;  %v361_v25 = vld [vmem:[%s1332_s20 + $0x1f0] sm:$0xff]  ;;  %v369_v27 = vpack.c.bf16 %v312_v13, %v311_v12 }
  0x8a   : > { %v344_v20 = vld [vmem:[%s1332_s20 + $0x168] sm:$0xff]  ;;  %v296_v23 = vpack.c.bf16 %v292_v17, %v292_v17  ;;  %v362_v26 = vld [vmem:[%s1332_s20 + $0x1f8] sm:$0xff]  ;;  %v378_v29 = vpack.c.bf16 %v330_v22, %v329_v21  ;;  %v313_v30 = vld [vmem:[%s1332_s20 + $0x70] sm:$0xff]  ;;  %467 = vmatprep.mubr.bf16.mxu1 %v298_v24 }
  0x8b   : > { %671 = vmatpush3.bf16.msra.mxu0 %v367_v63  ;;  %v385_v28 = vpack.c.bf16 %v344_v20, %v343_v16  ;;  %v314_v31 = vld [vmem:[%s1332_s20 + $0x78] sm:$0xff]  ;;  %v394_v32 = vpack.c.bf16 %v362_v26, %v361_v25  ;;  %v345_v33 = vld [vmem:[%s1332_s20 + $0x170] sm:$0xff]  ;;  %v291_v36 = vld [vmem:[%s1325_s5] sm:$0xff] }
  0x8c   : > { %693 = vmatpush3.bf16.msra.mxu1 %v383_v0  ;;  %672 = vmatprep.subr.bf16.mxu0 %v376_v1  ;;  %v346_v34 = vld [vmem:[%s1332_s20 + $0x178] sm:$0xff]  ;;  %v370_v35 = vpack.c.bf16 %v314_v31, %v313_v30  ;;  %v293_v38 = vld [vmem:[%s1325_s5 + $0x10] sm:$0xff]  ;;  %v295_v39 = vpack.c.bf16 %v291_v36, %v291_v36 }
  0x8d   : > { %694 = vmatprep.subr.bf16.mxu1 %v392_v5  ;;  %427 = vmatprep.mubr.bf16.mxu0 %v296_v23  ;;  %v386_v37 = vpack.c.bf16 %v346_v34, %v345_v33  ;;  %v297_v40 = vpack.c.bf16 %v293_v38, %v293_v38  ;;  %v290_v50 = vld [vmem:[#allocation2] sm:$0xff] }
  0x8e   : > { %v656_v55 = vld [vmem:[%s1500_s2] ss:$0 sm:$0xff] (!%p655_p4) }
  0x8f   : > { %673 = vmatpush3.bf16.msra.mxu0 %v368_v11 }
  0x90   : > { %695 = vmatpush3.bf16.msra.mxu1 %v384_v14  ;;  %674 = vmatprep.subr.bf16.mxu0 %v377_v15 }
  0x91   : > { %696 = vmatprep.subr.bf16.mxu1 %v393_v19 }
  0x93   : > { %675 = vmatpush3.bf16.msra.mxu0 %v369_v27 }
  0x94   : > { %697 = vmatpush3.bf16.msra.mxu1 %v385_v28  ;;  %676 = vmatprep.subr.bf16.mxu0 %v378_v29 }
  0x95   : > { %698 = vmatprep.subr.bf16.mxu1 %v394_v32 }
  0x97   : > { %677 = vmatpush3.bf16.msra.mxu0 %v370_v35 }
  0x98   : > { %699 = vmatpush3.bf16.msra.mxu1 %v386_v37 }
  0x9a   : > { %428 = vmatmul.mubr.bf16.vlgmr.msra.gmra.mrb[0].mxu0 %v295_v39 }
  0x9b   : > { %468 = vmatmul.mubr.bf16.vlgmr.msra.gmra.mrb[0].mxu1 %v297_v40 }
 0x16d   : > { %v678_v41 = vpop.f32.mrb[0].mxu0 }
 0x16e   : > { %v700_v42 = vpop.f32.mrb[0].mxu1  ;;  %v679_v43 = vpop.f32.mrb[1].mxu0 }
 0x16f   : > { %v680_v44 = vadd.f32 %v679_v43, %v678_v41  ;;  %v701_v45 = vpop.f32.mrb[1].mxu1  ;;  %v681_v46 = vpop.f32.mrb[2].mxu0 }
 0x170   : > { %v702_v47 = vadd.f32 %v701_v45, %v700_v42  ;;  %v703_v48 = vpop.f32.mrb[2].mxu1  ;;  %v682_v49 = vpop.f32.mrb[3].mxu0  ;;  %480 = sbr.rel (%p655_p4) target bundleno = 385 (0x181), region = 48 }
 0x171   : > { %v704_v51 = vpop.f32.mrb[3].mxu1 }
 0x172   : > { %v470_v52 = vadd.f32 %v702_v47, %v680_v44 }
 0x174   : > { %v475_v53 = vadd.f32 %v470_v52, %v290_v50 }
 0x176   : > { %476 = vst [vmem:[#allocation2] sm:$0xff] %v475_v53 }
 0x17d   : > { %v481_v54 = vld [vmem:[#allocation2] sm:$0xff] }
 0x17e   : > { %v489_v56 = vadd.f32 %v656_v55, %v481_v54 }
 0x180   : > { %490 = vst [vmem:[%s278_s7] sm:$0xff] %v489_v56 }
 0x181 PF: > { %s658_s8 = sshll.u32 %s1038_s22, 7  ;;  %s507_s14 = sshll.u32 %s278_s7, 4  ;;  %s508_s14 = int_to_ptr.vmem [resolvable:$true] %s507_s14 }
 0x182   : > { %s1423_s21 = scalar_lea.hbm %s1501_s3, %s658_s8  ;;  %s492_s15 = scalar_lea.sflag [#allocation5], %s276_s11 }
 0x183   : > { %s900_s4 = scalar_lea.vmem %s508_s14, 128  ;;  %p1534_p5 = scmp.ne.s32.totalorder %s1526_s30, 0 }
 0x184   : > { %p901_p12 = scmp.ne.s32.totalorder %s508_s14, %s900_s4  ;;  %s1057_s5 = smov [#allocation8]  }
 0x185   : > { %s904_s18 = sshll.u32 %s1057_s5, 4  ;;  %s905_s18 = int_to_ptr.vmem [resolvable:$false] %s904_s18 }
 0x186   : > { %p902_p3 = pnand %p901_p12, %p1534_p5  ;;  %s906_s28 = scalar_lea.vmem %s905_s18, 256 }
 0x187   : > { %p907_p9 = scmp.lt.s32.totalorder %s508_s14, %s905_s18  ;;  %p908_p8 = scmp.lt.s32.totalorder %s906_s28, %s900_s4 }
 0x188   : > { %p903_p7 = pneg %p902_p3 }
 0x189   : > { %p909_p10 = por %p908_p8, %p907_p9 }
 0x18b   : > { %p910_p6 = pnand %p909_p10, %p903_p7 }
 0x18d   : > { %913 = shalt.err (!%p910_p6)
}
 0x18e   : > { %s914_s22 = scalar_lea.hbm %s1423_s21, 128  ;;  %s918_s11 = scalar_lea.hbm %s1501_s3, 384 }
 0x18f   : > { %p915_p0 = scmp.ne.s32.totalorder %s1423_s21, %s914_s22  ;;  %p919_p11 = scmp.lt.u32.totalorder %s1423_s21, %s1501_s3 }
 0x190   : > { %p920_p1 = scmp.lt.u32.totalorder %s918_s11, %s914_s22  ;;  %p922_p12 = scmp.lt.u32.totalorder %s914_s22, %s1423_s21 }
 0x191   : > { %p916_p2 = pnand %p915_p0, %p1534_p5 }
 0x192   : > { %p921_p4 = por %p920_p1, %p919_p11 }
 0x193   : > { %p917_p13 = pneg %p916_p2 }
 0x194   : > { %p923_p3 = por %p922_p12, %p921_p4 }
 0x196   : > { %p924_p7 = pnand %p923_p3, %p917_p13 }
 0x198   : > { %927 = shalt.err (!%p924_p7)
}
 0x199   : > { %710 = dma.vmem_to_hbm [thread:$0]  (%p1534_p5), %s508_s14, 128, %s1423_s21, %s492_s15  }
 0x19a PF: > { %s1535_s26 = sld [smem:[#allocation12_spill]]  ;;  %p724_p9 = scmp.ge.s32.totalorder %s1050_s25, 2 }
 0x19b   : > { %p1536_p8 = scmp.ne.s32.totalorder %s1527_s6, 0 }
 0x19d   : > { %p720_p10 = pnand %p724_p9, %p1536_p8 }
 0x1a0   : > { %s519_s10 = sand.u32 1, %s1535_s26  }
 0x1a1   : > { %s520_s8 = scalar_lea.sflag [#allocation5], %s519_s10 }
 0x1a2   : > { %993 = dma.done.wait (!%p720_p10), %s520_s8, 128  }
 0x1a3   : > { %995 = vsyncadd (!%p720_p10), %s520_s8, 4294967168  ;;  %s22_s25 = sadd.s32 1, %s1050_s25   ;;  %s1538_s30 = sld [smem:[#allocation13_spill]] }
 0x1a4   : > { %p1451_p6 = scmp.ge.s32.totalorder %s22_s25, 8   ;;  %s1539_s14 = sld [smem:[#allocation19_spill]] }
 0x1a5   : > { %s1540_s21 = sld [smem:[#allocation17_spill]]  ;;  %s1541_s4 = sld [smem:[#allocation14_spill]] }
 0x1a6   : > { %s1542_s20 = sld [smem:[#allocation18_spill]]  ;;  %s1543_s6 = sld [smem:[#allocation15_spill]] }
 0x1a7   : > { %s1544_s5 = sld [smem:[#allocation16_spill]]  ;;  %s1545_s12 = smov %s1002_s13 }
 0x1a8   : > { %s1547_s15 = smov %s1014_s16  ;;  %s1548_s16 = smov %s1018_s17 }
 0x1a9   : > { %s1546_s13 = smov %s1538_s30  ;;  %s1550_s18 = smov %s1026_s19 }
 0x1aa   : > { %s1553_s22 = smov %s1046_s24  ;;  %21 = sbr.rel (!%p1451_p6) target bundleno = 12 (0xc), region = 101 }
 0x1ab   : > { %s1549_s17 = smov %s1540_s21  ;;  %s1551_s19 = smov %s1541_s4 }
 0x1ac   : > { %s1552_s21 = smov %s1042_s23  ;;  %s1554_s23 = smov %s1543_s6 }
 0x1ad   : > { %s1555_s24 = smov %s1544_s5 }
 0x1b1   :  { %525 = vsyncpa [#allocation4], 1 }
 0x1b2   :  { %527 = vsyncpa [#allocation4 + $0x1], 1 }
 0x1b3   :  { %528 = vsyncpa [#allocation7], 1 }
 0x1b4   :  { %530 = vsyncpa [#allocation7 + $0x1], 1 }
 0x1b5   :  { %531 = vsyncpa [#allocation5], 1 }
 0x1b6   :  { %533 = vsyncpa [#allocation5 + $0x1], 1 }

</bundles_post_ra>
